<compile_context>
chip_gen: v6e
topology: v6e:2x2x1
jax: 0.10.0
libtpu: 0.0.40
codegen_flags: <defaults>
</compile_context>

<pallas_src>
import math

import jax
import jax.numpy as jnp
from jax import lax
from jax.experimental import pallas as pl
from jax.experimental.pallas import tpu as pltpu


# ----------------------------------------------------------------------------
# helpers
# ----------------------------------------------------------------------------
def _pick_tile(n, preferred):
    """Largest convenient tile <= preferred that divides n (else full extent)."""
    if n <= preferred:
        return n
    for c in (preferred, 256, 128, 64, 32, 16, 8):
        if c <= preferred and n % c == 0:
            return c
    return n


def _tpu_defaults():
    """(attention tile pref, projection row tile pref, vmem budget bytes)."""
    attn_pref, proj_pref = 256, 256           # v6e/v7x: match 256-wide MXU
    vmem_budget = 32 * 1024 * 1024            # safe fallback everywhere
    try:
        kind = jax.devices()[0].device_kind.lower()
        if "v5 lite" in kind or "v5e" in kind:
            attn_pref = 128                   # v5e MXU is 4x128^2
            proj_pref = 512                   # projection is mem-bound on x
    except Exception:
        pass
    try:
        cap = int(pltpu.get_tpu_info().vmem_capacity_bytes)
        vmem_budget = min(100 * 1024 * 1024, (cap * 3) // 4)   # ~48MiB on v7x
    except Exception:
        pass
    return attn_pref, proj_pref, vmem_budget


def _store_heads(y, col0, o_ref):
    """Write y[:, col0 + h*ph : col0 + (h+1)*ph] into o_ref[0, h] per head."""
    heads, ph = o_ref.shape[1], o_ref.shape[3]
    for h in range(heads):
        o_ref[0, h] = y[:, col0 + h * ph: col0 + (h + 1) * ph].astype(o_ref.dtype)


# ----------------------------------------------------------------------------
# Kernel 1: QKV projection into [batch, heads, seq, per_head]
# ----------------------------------------------------------------------------
def _qkv_proj_self_kernel(x_ref, w_ref, b_ref, qo_ref, ko_ref, vo_ref):
    """Self-attention path: one [TM, hidden] x [hidden, 3*hidden] MXU matmul."""
    heads, ph = qo_ref.shape[1], qo_ref.shape[3]
    hidden = heads * ph
    x = x_ref[0].astype(w_ref.dtype)                         # [TM, hidden]
    y = jnp.dot(x, w_ref[...], preferred_element_type=jnp.float32)
    y = y + b_ref[...]                                       # [TM, 3*hidden] f32
    _store_heads(y, 0, qo_ref)
    _store_heads(y, hidden, ko_ref)
    _store_heads(y, 2 * hidden, vo_ref)


def _qkv_proj_cross_kernel(xq_ref, xk_ref, xv_ref, w_ref, b_ref,
                           qo_ref, ko_ref, vo_ref):
    """General path (distinct query/key/value): three full-width matmuls."""
    for j, (x_ref, o_ref) in enumerate(
            ((xq_ref, qo_ref), (xk_ref, ko_ref), (xv_ref, vo_ref))):
        x = x_ref[0].astype(w_ref.dtype)
        y = jnp.dot(x, w_ref[j], preferred_element_type=jnp.float32) + b_ref[j]
        _store_heads(y, 0, o_ref)


# ----------------------------------------------------------------------------
# Kernel 2: head-batched flash attention + fused output projection
# ----------------------------------------------------------------------------
def _make_attn_kernel(*, heads, tq, tkv, hidden, has_mask, causal, approx_recip):
    def kernel(*refs):
        if has_mask:
            (mask_ref, q_ref, k_ref, v_ref, wo_ref, bo_ref,
             o_ref, m_s, l_s, acc_s) = refs
        else:
            (q_ref, k_ref, v_ref, wo_ref, bo_ref,
             o_ref, m_s, l_s, acc_s) = refs
            mask_ref = None

        kv = pl.program_id(2)

        @pl.when(kv == 0)
        def _init():
            m_s[...] = jnp.full(m_s.shape, -jnp.inf, m_s.dtype)
            l_s[...] = jnp.zeros(l_s.shape, l_s.dtype)
            acc_s[...] = jnp.zeros(acc_s.shape, acc_s.dtype)

        def tile_update(bias):
            q = q_ref[0]               # [heads, TQ,  ph]  (Wq pre-scaled)
            k = k_ref[0]               # [heads, TKV, ph]
            v = v_ref[0]               # [heads, TKV, ph]
            # scores[h, q, k] = sum_d q[h, q, d] * k[h, k, d]
            s = lax.dot_general(q, k, (((2,), (2,)), ((0,), (0,))),
                                preferred_element_type=jnp.float32)
            if bias is not None:
                s = s + bias           # [TQ, TKV] broadcasts over heads
            m_prev = m_s[...]
            m_new = jnp.maximum(m_prev, jnp.max(s, axis=-1, keepdims=True))
            alpha = jnp.exp(m_prev - m_new)
            p = jnp.exp(s - m_new)
            l_s[...] = alpha * l_s[...] + jnp.sum(p, axis=-1, keepdims=True)
            # pv[h, q, d] = sum_k p[h, q, k] * v[h, k, d]
            pv = lax.dot_general(p.astype(v.dtype), v,
                                 (((2,), (1,)), ((0,), (0,))),
                                 preferred_element_type=jnp.float32)
            acc_s[...] = alpha * acc_s[...] + pv
            m_s[...] = m_new

        if has_mask:
            tile_update(mask_ref[0, 0].astype(jnp.float32))
        elif causal:
            q_off = pl.program_id(1) * tq
            k_off = kv * tkv

            @pl.when(k_off <= q_off + (tq - 1))   # skip fully-masked KV tiles
            def _live_tile():
                rows = q_off + lax.broadcasted_iota(jnp.int32, (tq, tkv), 0)
                cols = k_off + lax.broadcasted_iota(jnp.int32, (tq, tkv), 1)
                tile_update(jnp.where(cols > rows, -1e9, 0.0).astype(jnp.float32))
        else:
            tile_update(None)

        @pl.when(kv == pl.num_programs(2) - 1)
        def _finalize():
            # TODO(synk): dropout(probs) and the lena/kg branches are omitted.
            if approx_recip:
                inv_l = pl.reciprocal(l_s[...], approx=True)
            else:
                inv_l = 1.0 / l_s[...]
            ctx = (acc_s[...] * inv_l).astype(wo_ref.dtype)   # [heads, TQ, ph]
            # Accumulate per-head output projections directly into one
            # [TQ, hidden] f32 buffer (no [heads, TQ, hidden] intermediate,
            # no VPU head-sum).
            out = jnp.zeros((tq, hidden), jnp.float32)
            for h in range(heads):
                out = out + jnp.dot(ctx[h], wo_ref[h],
                                    preferred_element_type=jnp.float32)
            out = out + bo_ref[...]
            o_ref[0] = out.astype(o_ref.dtype)

    return kernel


# ----------------------------------------------------------------------------
# Wrapper
# ----------------------------------------------------------------------------
def multi_headed_attention(key, value, query, mask, params, heads_num, *,
                           causal=False, compute_dtype=None,
                           approx_reciprocal=True):
    """Pallas forward matching MultiHeadedAttention.forward (lena=kg=None).

    mask:   [batch, 1, seq, seq] additive mask, or None.
    causal: if True and mask is None, a causal (-1e9 upper-triangle) additive
            mask is generated inside the attention kernel (no HBM mask stream)
            and fully-masked KV tiles are skipped.
    Note: mask values must be finite (use a large negative, not -inf).
    """
    batch, seq, hidden = key.shape
    assert hidden % heads_num == 0, "hidden_size must be divisible by heads_num"
    per_head = hidden // heads_num
    if compute_dtype is None:
        compute_dtype = query.dtype
    cdt = jnp.dtype(compute_dtype)
    scale = 1.0 / math.sqrt(float(per_head))

    attn_pref, proj_pref, vmem_budget = _tpu_defaults()
    tm = _pick_tile(seq, proj_pref)      # projection row tile
    tq = _pick_tile(seq, attn_pref)      # attention query tile
    tkv = _pick_tile(seq, attn_pref)     # attention key/value tile

    # --- host-side weight prep (PyTorch Linear: y = x @ W.T + b, W:[out,in]) --
    wq_t = params["wq"].T * scale        # fold 1/sqrt(per_head) into Q proj
    bq_s = params["bq"] * scale
    wo_h = params["wo"].T.reshape(heads_num, per_head, hidden).astype(compute_dtype)
    bo_r = params["bo"].reshape(1, hidden).astype(jnp.float32)

    proj_shape = jax.ShapeDtypeStruct((batch, heads_num, seq, per_head),
                                      compute_dtype)
    x_spec = pl.BlockSpec((1, tm, hidden), lambda b, t: (b, t, 0))
    o_spec = pl.BlockSpec((1, heads_num, tm, per_head), lambda b, t: (b, 0, t, 0))
    proj_params = pltpu.CompilerParams(
        dimension_semantics=("parallel", "parallel"),
        vmem_limit_bytes=vmem_budget)

    self_attn = (query is key) and (key is value)
    if self_attn:
        # Fused [hidden, 3*hidden] weight: columns = [Wq*scale | Wk | Wv].
        w_fused = jnp.concatenate(
            [wq_t, params["wk"].T, params["wv"].T], axis=1).astype(compute_dtype)
        b_fused = jnp.concatenate(
            [bq_s, params["bk"], params["bv"]]
        ).reshape(1, 3 * hidden).astype(jnp.float32)
        q_p, k_p, v_p = pl.pallas_call(
            _qkv_proj_self_kernel,
            out_shape=(proj_shape, proj_shape, proj_shape),
            grid_spec=pltpu.PrefetchScalarGridSpec(
                num_scalar_prefetch=0,
                grid=(batch, seq // tm),
                in_specs=[x_spec,
                          pl.BlockSpec((hidden, 3 * hidden), lambda b, t: (0, 0)),
                          pl.BlockSpec((1, 3 * hidden), lambda b, t: (0, 0))],
                out_specs=[o_spec, o_spec, o_spec]),
            compiler_params=proj_params,
            cost_estimate=pl.CostEstimate(
                flops=int(6 * batch * seq * hidden * hidden),
                transcendentals=0,
                bytes_accessed=int(
                    batch * seq * hidden * query.dtype.itemsize
                    + (3 * hidden * hidden + 3 * hidden) * cdt.itemsize
                    + 3 * batch * seq * hidden * cdt.itemsize)),
        )(query, w_fused, b_fused)
    else:
        w3 = jnp.stack([wq_t, params["wk"].T, params["wv"].T]).astype(compute_dtype)
        b3 = jnp.stack([bq_s, params["bk"], params["bv"]]
                       ).reshape(3, 1, hidden).astype(jnp.float32)
        q_p, k_p, v_p = pl.pallas_call(
            _qkv_proj_cross_kernel,
            out_shape=(proj_shape, proj_shape, proj_shape),
            grid_spec=pltpu.PrefetchScalarGridSpec(
                num_scalar_prefetch=0,
                grid=(batch, seq // tm),
                in_specs=[x_spec, x_spec, x_spec,
                          pl.BlockSpec((3, hidden, hidden),
                                       lambda b, t: (0, 0, 0)),
                          pl.BlockSpec((3, 1, hidden), lambda b, t: (0, 0, 0))],
                out_specs=[o_spec, o_spec, o_spec]),
            compiler_params=proj_params,
            cost_estimate=pl.CostEstimate(
                flops=int(6 * batch * seq * hidden * hidden),
                transcendentals=0,
                bytes_accessed=int(
                    3 * batch * seq * hidden * query.dtype.itemsize
                    + (3 * hidden * hidden + 3 * hidden) * cdt.itemsize
                    + 3 * batch * seq * hidden * cdt.itemsize)),
        )(query, key, value, w3, b3)

    # --- kernel 2: flash attention + output projection ------------------------
    has_mask = mask is not None
    kernel2 = _make_attn_kernel(heads=heads_num, tq=tq, tkv=tkv, hidden=hidden,
                                has_mask=has_mask,
                                causal=(causal and not has_mask),
                                approx_recip=approx_reciprocal)

    in_specs = []
    inputs = []
    bytes2 = 0
    if has_mask:
        in_specs.append(pl.BlockSpec((1, 1, tq, tkv),
                                     lambda b, qi, ki: (b, 0, qi, ki)))
        inputs.append(mask)
        bytes2 += batch * seq * seq * mask.dtype.itemsize
    in_specs += [
        pl.BlockSpec((1, heads_num, tq, per_head),
                     lambda b, qi, ki: (b, 0, qi, 0)),                # q_proj
        pl.BlockSpec((1, heads_num, tkv, per_head),
                     lambda b, qi, ki: (b, 0, ki, 0)),                # k_proj
        pl.BlockSpec((1, heads_num, tkv, per_head),
                     lambda b, qi, ki: (b, 0, ki, 0)),                # v_proj
        pl.BlockSpec((heads_num, per_head, hidden),
                     lambda b, qi, ki: (0, 0, 0)),                    # Wo
        pl.BlockSpec((1, hidden), lambda b, qi, ki: (0, 0)),          # bo
    ]
    inputs += [q_p, k_p, v_p, wo_h, bo_r]
    # q read once; k/v re-read once per query tile; + Wo/bo + output.
    bytes2 += int((1 + 2 * (seq // tq)) * batch * seq * hidden * cdt.itemsize
                  + (hidden * hidden + hidden) * cdt.itemsize
                  + batch * seq * hidden * query.dtype.itemsize)

    out = pl.pallas_call(
        kernel2,
        out_shape=jax.ShapeDtypeStruct((batch, seq, hidden), query.dtype),
        grid_spec=pltpu.PrefetchScalarGridSpec(
            num_scalar_prefetch=0,
            grid=(batch, seq // tq, seq // tkv),
            in_specs=in_specs,
            out_specs=pl.BlockSpec((1, tq, hidden),
                                   lambda b, qi, ki: (b, qi, 0)),
            scratch_shapes=[
                pltpu.VMEM((heads_num, tq, 1), jnp.float32),          # run. max
                pltpu.VMEM((heads_num, tq, 1), jnp.float32),          # run. denom
                pltpu.VMEM((heads_num, tq, per_head), jnp.float32),   # acc
            ]),
        compiler_params=pltpu.CompilerParams(
            dimension_semantics=("parallel", "parallel", "arbitrary"),
            vmem_limit_bytes=vmem_budget),
        cost_estimate=pl.CostEstimate(
            flops=int(4 * batch * heads_num * seq * seq * per_head
                      + 2 * batch * seq * hidden * hidden),
            transcendentals=int(batch * heads_num * seq * seq),
            bytes_accessed=bytes2),
    )(*inputs)
    return out


# ----------------------------------------------------------------------------
# Pure-JAX reference mirroring the PyTorch forward (lena=kg=None, no dropout)
# ----------------------------------------------------------------------------
def _reference(key, value, query, mask, params, heads_num):
    batch, seq, hidden = key.shape
    ph = hidden // heads_num

    def lin(x, w, b):
        return x @ w.T + b

    def split(x):
        return x.reshape(batch, seq, heads_num, ph).transpose(0, 2, 1, 3)

    q = split(lin(query, params["wq"], params["bq"]))
    k = split(lin(key,   params["wk"], params["bk"]))
    v = split(lin(value, params["wv"], params["bv"]))

    scores = jnp.einsum("bhqd,bhkd->bhqk", q, k) / math.sqrt(float(ph)) + mask
    probs = jax.nn.softmax(scores, axis=-1)
    ctx = jnp.einsum("bhqk,bhkd->bhqd", probs, v)
    ctx = ctx.transpose(0, 2, 1, 3).reshape(batch, seq, hidden)
    return lin(ctx, params["wo"], params["bo"])


if __name__ == "__main__":
    batch, seq, hidden, heads = 2, 8, 32, 4

    root = jax.random.PRNGKey(0)
    keys = jax.random.split(root, 12)

    init_scale = 1.0 / math.sqrt(hidden)

    def u(k, shape):
        return jax.random.uniform(k, shape, jnp.float32, -init_scale, init_scale)

    params = {
        "wq": u(keys[0], (hidden, hidden)), "bq": u(keys[1], (hidden,)),
        "wk": u(keys[2], (hidden, hidden)), "bk": u(keys[3], (hidden,)),
        "wv": u(keys[4], (hidden, hidden)), "bv": u(keys[5], (hidden,)),
        "wo": u(keys[6], (hidden, hidden)), "bo": u(keys[7], (hidden,)),
    }

    x = jax.random.normal(keys[8], (batch, seq, hidden), jnp.float32)
    k_in = jax.random.normal(keys[9], (batch, seq, hidden), jnp.float32)
    v_in = jax.random.normal(keys[10], (batch, seq, hidden), jnp.float32)

    # Additive causal mask (large finite negative above the diagonal).
    causal_add = jnp.triu(jnp.ones((seq, seq), jnp.float32), k=1) * -1e9
    mask = jnp.broadcast_to(causal_add, (batch, 1, seq, seq))

    # 1) Self-attention fast path: fused QKV projection + in-kernel causal mask.
    ref_self = _reference(x, x, x, mask, params, heads)
    out_self = multi_headed_attention(x, x, x, None, params, heads, causal=True)
    out_self = jax.block_until_ready(out_self)
    assert out_self.shape == (batch, seq, hidden)
    assert jnp.allclose(out_self, ref_self, atol=2e-3, rtol=2e-3), \
        "self-attention causal path mismatch vs JAX reference"

    # 2) General path: distinct key/value/query + explicit streamed mask.
    ref_gen = _reference(k_in, v_in, x, mask, params, heads)
    out_gen = multi_headed_attention(k_in, v_in, x, mask, params, heads)
    out_gen = jax.block_until_ready(out_gen)
    assert out_gen.shape == (batch, seq, hidden)
    assert jnp.allclose(out_gen, ref_gen, atol=2e-3, rtol=2e-3), \
        "general masked path mismatch vs JAX reference"

    # 3) bf16 MXU operands (f32 accumulation): loose sanity check.
    out_bf16 = multi_headed_attention(x, x, x, None, params, heads, causal=True,
                                      compute_dtype=jnp.bfloat16)
    out_bf16 = jax.block_until_ready(out_bf16)
    assert out_bf16.shape == (batch, seq, hidden)
    assert bool(jnp.all(jnp.isfinite(out_bf16)))
    assert float(jnp.max(jnp.abs(out_bf16 - ref_self))) < 0.5, "bf16 path grossly wrong"

    print("KERNEL_OK")
</pallas_src>

<mosaic_0001>
module attributes {stable_mosaic.version = 11 : i64} {
  func.func @_qkv_proj_self_kernel(%arg0: i32, %arg1: i32, %arg2: memref<1x8x32xf32, #tpu.memory_space<vmem>>, %arg3: memref<32x96xf32, #tpu.memory_space<vmem>>, %arg4: memref<1x96xf32, #tpu.memory_space<vmem>>, %arg5: memref<1x4x8x8xf32, #tpu.memory_space<vmem>>, %arg6: memref<1x4x8x8xf32, #tpu.memory_space<vmem>>, %arg7: memref<1x4x8x8xf32, #tpu.memory_space<vmem>>) attributes {dimension_semantics = [#tpu.dimension_semantics<parallel>, #tpu.dimension_semantics<parallel>], iteration_bounds = array<i64: 2, 1>, scalar_prefetch = 0 : i64, scratch_operands = 0 : i64, tpu.core_type = #tpu.core_type<tc>, window_params = [{transform_indices = @transform_0, window_bounds = array<i64: 1, 8, 32>}, {pipeline_mode = #tpu.pipeline_mode<synchronous>, transform_indices = @transform_1, window_bounds = array<i64: 32, 96>}, {pipeline_mode = #tpu.pipeline_mode<synchronous>, transform_indices = @transform_2, window_bounds = array<i64: 1, 96>}, {transform_indices = @transform_3, window_bounds = array<i64: 1, 4, 8, 8>}, {transform_indices = @transform_4, window_bounds = array<i64: 1, 4, 8, 8>}, {transform_indices = @transform_5, window_bounds = array<i64: 1, 4, 8, 8>}]} {
    %c0 = arith.constant 0 : index
    %c0_0 = arith.constant 0 : index
    %c0_1 = arith.constant 0 : index
    %0 = vector.load %arg2[%c0, %c0_0, %c0_1] : memref<1x8x32xf32, #tpu.memory_space<vmem>>, vector<1x8x32xf32>
    %1 = vector.shape_cast %0 : vector<1x8x32xf32> to vector<8x32xf32>
    %c0_2 = arith.constant 0 : index
    %c0_3 = arith.constant 0 : index
    %2 = vector.load %arg3[%c0_2, %c0_3] : memref<32x96xf32, #tpu.memory_space<vmem>>, vector<32x96xf32>
    %cst = arith.constant dense<0.000000e+00> : vector<8x96xf32>
    %3 = tpu.matmul %1, %2, %cst {dimension_numbers = #tpu.dot_dimension_numbers<[1], [0], [0], [1], [0, 0, 1, 1], [], []>} : vector<8x32xf32>, vector<32x96xf32>, vector<8x96xf32> -> vector<8x96xf32>
    %c0_4 = arith.constant 0 : index
    %c0_5 = arith.constant 0 : index
    %4 = vector.load %arg4[%c0_4, %c0_5] : memref<1x96xf32, #tpu.memory_space<vmem>>, vector<1x96xf32>
    %5 = vector.broadcast %4 : vector<1x96xf32> to vector<8x96xf32>
    %6 = arith.addf %3, %5 : vector<8x96xf32>
    %7 = vector.extract_strided_slice %6 {offsets = [0, 0], sizes = [8, 8], strides = [1, 1]} : vector<8x96xf32> to vector<8x8xf32>
    %c0_6 = arith.constant 0 : index
    %c0_7 = arith.constant 0 : index
    %c0_8 = arith.constant 0 : index
    %c0_9 = arith.constant 0 : index
    %8 = vector.load %arg5[%c0_6, %c0_7, %c0_8, %c0_9] : memref<1x4x8x8xf32, #tpu.memory_space<vmem>>, vector<1x1x8x8xf32>
    %9 = vector.shape_cast %8 : vector<1x1x8x8xf32> to vector<8x8xf32>
    %10 = vector.shape_cast %7 : vector<8x8xf32> to vector<1x1x8x8xf32>
    tpu.vector_store %arg5[%c0_6, %c0_7, %c0_8, %c0_9], %10 {strides = array<i32>} : memref<1x4x8x8xf32, #tpu.memory_space<vmem>>, vector<1x1x8x8xf32>,
    %11 = vector.extract_strided_slice %6 {offsets = [0, 8], sizes = [8, 8], strides = [1, 1]} : vector<8x96xf32> to vector<8x8xf32>
    %c0_10 = arith.constant 0 : index
    %c1 = arith.constant 1 : index
    %c0_11 = arith.constant 0 : index
    %c0_12 = arith.constant 0 : index
    %12 = vector.load %arg5[%c0_10, %c1, %c0_11, %c0_12] : memref<1x4x8x8xf32, #tpu.memory_space<vmem>>, vector<1x1x8x8xf32>
    %13 = vector.shape_cast %12 : vector<1x1x8x8xf32> to vector<8x8xf32>
    %14 = vector.shape_cast %11 : vector<8x8xf32> to vector<1x1x8x8xf32>
    tpu.vector_store %arg5[%c0_10, %c1, %c0_11, %c0_12], %14 {strides = array<i32>} : memref<1x4x8x8xf32, #tpu.memory_space<vmem>>, vector<1x1x8x8xf32>,
    %15 = vector.extract_strided_slice %6 {offsets = [0, 16], sizes = [8, 8], strides = [1, 1]} : vector<8x96xf32> to vector<8x8xf32>
    %c0_13 = arith.constant 0 : index
    %c2 = arith.constant 2 : index
    %c0_14 = arith.constant 0 : index
    %c0_15 = arith.constant 0 : index
    %16 = vector.load %arg5[%c0_13, %c2, %c0_14, %c0_15] : memref<1x4x8x8xf32, #tpu.memory_space<vmem>>, vector<1x1x8x8xf32>
    %17 = vector.shape_cast %16 : vector<1x1x8x8xf32> to vector<8x8xf32>
    %18 = vector.shape_cast %15 : vector<8x8xf32> to vector<1x1x8x8xf32>
    tpu.vector_store %arg5[%c0_13, %c2, %c0_14, %c0_15], %18 {strides = array<i32>} : memref<1x4x8x8xf32, #tpu.memory_space<vmem>>, vector<1x1x8x8xf32>,
    %19 = vector.extract_strided_slice %6 {offsets = [0, 24], sizes = [8, 8], strides = [1, 1]} : vector<8x96xf32> to vector<8x8xf32>
    %c0_16 = arith.constant 0 : index
    %c3 = arith.constant 3 : index
    %c0_17 = arith.constant 0 : index
    %c0_18 = arith.constant 0 : index
    %20 = vector.load %arg5[%c0_16, %c3, %c0_17, %c0_18] : memref<1x4x8x8xf32, #tpu.memory_space<vmem>>, vector<1x1x8x8xf32>
    %21 = vector.shape_cast %20 : vector<1x1x8x8xf32> to vector<8x8xf32>
    %22 = vector.shape_cast %19 : vector<8x8xf32> to vector<1x1x8x8xf32>
    tpu.vector_store %arg5[%c0_16, %c3, %c0_17, %c0_18], %22 {strides = array<i32>} : memref<1x4x8x8xf32, #tpu.memory_space<vmem>>, vector<1x1x8x8xf32>,
    %23 = vector.extract_strided_slice %6 {offsets = [0, 32], sizes = [8, 8], strides = [1, 1]} : vector<8x96xf32> to vector<8x8xf32>
    %c0_19 = arith.constant 0 : index
    %c0_20 = arith.constant 0 : index
    %c0_21 = arith.constant 0 : index
    %c0_22 = arith.constant 0 : index
    %24 = vector.load %arg6[%c0_19, %c0_20, %c0_21, %c0_22] : memref<1x4x8x8xf32, #tpu.memory_space<vmem>>, vector<1x1x8x8xf32>
    %25 = vector.shape_cast %24 : vector<1x1x8x8xf32> to vector<8x8xf32>
    %26 = vector.shape_cast %23 : vector<8x8xf32> to vector<1x1x8x8xf32>
    tpu.vector_store %arg6[%c0_19, %c0_20, %c0_21, %c0_22], %26 {strides = array<i32>} : memref<1x4x8x8xf32, #tpu.memory_space<vmem>>, vector<1x1x8x8xf32>,
    %27 = vector.extract_strided_slice %6 {offsets = [0, 40], sizes = [8, 8], strides = [1, 1]} : vector<8x96xf32> to vector<8x8xf32>
    %c0_23 = arith.constant 0 : index
    %c1_24 = arith.constant 1 : index
    %c0_25 = arith.constant 0 : index
    %c0_26 = arith.constant 0 : index
    %28 = vector.load %arg6[%c0_23, %c1_24, %c0_25, %c0_26] : memref<1x4x8x8xf32, #tpu.memory_space<vmem>>, vector<1x1x8x8xf32>
    %29 = vector.shape_cast %28 : vector<1x1x8x8xf32> to vector<8x8xf32>
    %30 = vector.shape_cast %27 : vector<8x8xf32> to vector<1x1x8x8xf32>
    tpu.vector_store %arg6[%c0_23, %c1_24, %c0_25, %c0_26], %30 {strides = array<i32>} : memref<1x4x8x8xf32, #tpu.memory_space<vmem>>, vector<1x1x8x8xf32>,
    %31 = vector.extract_strided_slice %6 {offsets = [0, 48], sizes = [8, 8], strides = [1, 1]} : vector<8x96xf32> to vector<8x8xf32>
    %c0_27 = arith.constant 0 : index
    %c2_28 = arith.constant 2 : index
    %c0_29 = arith.constant 0 : index
    %c0_30 = arith.constant 0 : index
    %32 = vector.load %arg6[%c0_27, %c2_28, %c0_29, %c0_30] : memref<1x4x8x8xf32, #tpu.memory_space<vmem>>, vector<1x1x8x8xf32>
    %33 = vector.shape_cast %32 : vector<1x1x8x8xf32> to vector<8x8xf32>
    %34 = vector.shape_cast %31 : vector<8x8xf32> to vector<1x1x8x8xf32>
    tpu.vector_store %arg6[%c0_27, %c2_28, %c0_29, %c0_30], %34 {strides = array<i32>} : memref<1x4x8x8xf32, #tpu.memory_space<vmem>>, vector<1x1x8x8xf32>,
    %35 = vector.extract_strided_slice %6 {offsets = [0, 56], sizes = [8, 8], strides = [1, 1]} : vector<8x96xf32> to vector<8x8xf32>
    %c0_31 = arith.constant 0 : index
    %c3_32 = arith.constant 3 : index
    %c0_33 = arith.constant 0 : index
    %c0_34 = arith.constant 0 : index
    %36 = vector.load %arg6[%c0_31, %c3_32, %c0_33, %c0_34] : memref<1x4x8x8xf32, #tpu.memory_space<vmem>>, vector<1x1x8x8xf32>
    %37 = vector.shape_cast %36 : vector<1x1x8x8xf32> to vector<8x8xf32>
    %38 = vector.shape_cast %35 : vector<8x8xf32> to vector<1x1x8x8xf32>
    tpu.vector_store %arg6[%c0_31, %c3_32, %c0_33, %c0_34], %38 {strides = array<i32>} : memref<1x4x8x8xf32, #tpu.memory_space<vmem>>, vector<1x1x8x8xf32>,
    %39 = vector.extract_strided_slice %6 {offsets = [0, 64], sizes = [8, 8], strides = [1, 1]} : vector<8x96xf32> to vector<8x8xf32>
    %c0_35 = arith.constant 0 : index
    %c0_36 = arith.constant 0 : index
    %c0_37 = arith.constant 0 : index
    %c0_38 = arith.constant 0 : index
    %40 = vector.load %arg7[%c0_35, %c0_36, %c0_37, %c0_38] : memref<1x4x8x8xf32, #tpu.memory_space<vmem>>, vector<1x1x8x8xf32>
    %41 = vector.shape_cast %40 : vector<1x1x8x8xf32> to vector<8x8xf32>
    %42 = vector.shape_cast %39 : vector<8x8xf32> to vector<1x1x8x8xf32>
    tpu.vector_store %arg7[%c0_35, %c0_36, %c0_37, %c0_38], %42 {strides = array<i32>} : memref<1x4x8x8xf32, #tpu.memory_space<vmem>>, vector<1x1x8x8xf32>,
    %43 = vector.extract_strided_slice %6 {offsets = [0, 72], sizes = [8, 8], strides = [1, 1]} : vector<8x96xf32> to vector<8x8xf32>
    %c0_39 = arith.constant 0 : index
    %c1_40 = arith.constant 1 : index
    %c0_41 = arith.constant 0 : index
    %c0_42 = arith.constant 0 : index
    %44 = vector.load %arg7[%c0_39, %c1_40, %c0_41, %c0_42] : memref<1x4x8x8xf32, #tpu.memory_space<vmem>>, vector<1x1x8x8xf32>
    %45 = vector.shape_cast %44 : vector<1x1x8x8xf32> to vector<8x8xf32>
    %46 = vector.shape_cast %43 : vector<8x8xf32> to vector<1x1x8x8xf32>
    tpu.vector_store %arg7[%c0_39, %c1_40, %c0_41, %c0_42], %46 {strides = array<i32>} : memref<1x4x8x8xf32, #tpu.memory_space<vmem>>, vector<1x1x8x8xf32>,
    %47 = vector.extract_strided_slice %6 {offsets = [0, 80], sizes = [8, 8], strides = [1, 1]} : vector<8x96xf32> to vector<8x8xf32>
    %c0_43 = arith.constant 0 : index
    %c2_44 = arith.constant 2 : index
    %c0_45 = arith.constant 0 : index
    %c0_46 = arith.constant 0 : index
    %48 = vector.load %arg7[%c0_43, %c2_44, %c0_45, %c0_46] : memref<1x4x8x8xf32, #tpu.memory_space<vmem>>, vector<1x1x8x8xf32>
    %49 = vector.shape_cast %48 : vector<1x1x8x8xf32> to vector<8x8xf32>
    %50 = vector.shape_cast %47 : vector<8x8xf32> to vector<1x1x8x8xf32>
    tpu.vector_store %arg7[%c0_43, %c2_44, %c0_45, %c0_46], %50 {strides = array<i32>} : memref<1x4x8x8xf32, #tpu.memory_space<vmem>>, vector<1x1x8x8xf32>,
    %51 = vector.extract_strided_slice %6 {offsets = [0, 88], sizes = [8, 8], strides = [1, 1]} : vector<8x96xf32> to vector<8x8xf32>
    %c0_47 = arith.constant 0 : index
    %c3_48 = arith.constant 3 : index
    %c0_49 = arith.constant 0 : index
    %c0_50 = arith.constant 0 : index
    %52 = vector.load %arg7[%c0_47, %c3_48, %c0_49, %c0_50] : memref<1x4x8x8xf32, #tpu.memory_space<vmem>>, vector<1x1x8x8xf32>
    %53 = vector.shape_cast %52 : vector<1x1x8x8xf32> to vector<8x8xf32>
    %54 = vector.shape_cast %51 : vector<8x8xf32> to vector<1x1x8x8xf32>
    tpu.vector_store %arg7[%c0_47, %c3_48, %c0_49, %c0_50], %54 {strides = array<i32>} : memref<1x4x8x8xf32, #tpu.memory_space<vmem>>, vector<1x1x8x8xf32>,
    return
  }
  func.func @transform_0(%arg0: i32, %arg1: i32) -> (i32, i32, i32) {
    %c0_i32 = arith.constant 0 : i32
    %c0_i32_0 = arith.constant 0 : i32
    return %arg0, %arg1, %c0_i32 : i32, i32, i32
  }
  func.func @transform_1(%arg0: i32, %arg1: i32) -> (i32, i32) {
    %c0_i32 = arith.constant 0 : i32
    %c0_i32_0 = arith.constant 0 : i32
    %c0_i32_1 = arith.constant 0 : i32
    return %c0_i32, %c0_i32_0 : i32, i32
  }
  func.func @transform_2(%arg0: i32, %arg1: i32) -> (i32, i32) {
    %c0_i32 = arith.constant 0 : i32
    %c0_i32_0 = arith.constant 0 : i32
    %c0_i32_1 = arith.constant 0 : i32
    return %c0_i32, %c0_i32_0 : i32, i32
  }
  func.func @transform_3(%arg0: i32, %arg1: i32) -> (i32, i32, i32, i32) {
    %c0_i32 = arith.constant 0 : i32
    %c0_i32_0 = arith.constant 0 : i32
    %c0_i32_1 = arith.constant 0 : i32
    return %arg0, %c0_i32, %arg1, %c0_i32_0 : i32, i32, i32, i32
  }
  func.func @transform_4(%arg0: i32, %arg1: i32) -> (i32, i32, i32, i32) {
    %c0_i32 = arith.constant 0 : i32
    %c0_i32_0 = arith.constant 0 : i32
    %c0_i32_1 = arith.constant 0 : i32
    return %arg0, %c0_i32, %arg1, %c0_i32_0 : i32, i32, i32, i32
  }
  func.func @transform_5(%arg0: i32, %arg1: i32) -> (i32, i32, i32, i32) {
    %c0_i32 = arith.constant 0 : i32
    %c0_i32_0 = arith.constant 0 : i32
    %c0_i32_1 = arith.constant 0 : i32
    return %arg0, %c0_i32, %arg1, %c0_i32_0 : i32, i32, i32, i32
  }
}

</mosaic_0001>

<bundles_post_ra>
// kernel: tpu_custom_call.1
= control target key start
LH: loop header
LB: loop body
LE: loop exit
PB: predicated region body
PF: predicated region fallthrough
CT: control target
= control target key end

     0   :  { %s1343_s0 = inlined_call_operand.hbm [shape: f32[2,8,32], index: 0, kind: input, shape index: {}]   ;;  %s1344_s1 = inlined_call_operand.hbm [shape: f32[32,96], index: 1, kind: input, shape index: {}]   ;;  %s1345_s2 = inlined_call_operand.vmem [shape: f32[1,96], index: 2, kind: input, shape index: {}]   ;;  %s1346_s3 = inlined_call_operand.hbm [shape: f32[2,4,8,8], index: 3, kind: output, shape index: {0}]   ;;  %s1347_s4 = inlined_call_operand.hbm [shape: f32[2,4,8,8], index: 4, kind: output, shape index: {1}]   ;;  %s1348_s5 = inlined_call_operand.hbm [shape: f32[2,4,8,8], index: 5, kind: output, shape index: {2}]  }
   0x1   :  { %1352 = sst [smem:[#allocation16_spill]] %s1344_s1 }
   0x2   :  { %11 = vsyncpa [#allocation3], 0 }
   0x3   :  { %13 = vsyncpa [#allocation3 + $0x1], 0 }
   0x4   :  { %14 = vsyncpa [#allocation6], 0 }
   0x5   :  { %15 = vsyncpa [#allocation4], 0 }
   0x6   :  { %17 = vsyncpa [#allocation4 + $0x1], 0 }
   0x7   :  { %18 = vsyncpa [#allocation9], 0 }
   0x8   :  { %20 = vsyncpa [#allocation9 + $0x1], 0  ;;  %s1056_s18 = smov 0   ;;  %s1058_s19 = smov 0  }
   0x9   :  { %s1060_s20 = smov 0   ;;  %s1062_s21 = smov 0  }
   0xa   :  { %s1064_s22 = smov 0   ;;  %s1066_s23 = smov 0  }
   0xb LB: > { %s1087_s24 = sadd.s32 4294967295, %s1002_s23   ;;  %s1349_s25 = sadd.s32 4294967294, %s1002_s23   ;;  %s1002_s23 = sphi %s1066_s23, %s26_s23   ;;  %s998_s22 = sphi %s1064_s22, %s1373_s22   ;;  %s994_s21 = sphi %s1062_s21, %s1372_s21   ;;  %s990_s20 = sphi %s1060_s20, %s1371_s20   ;;  %s986_s19 = sphi %s1058_s19, %s1370_s19   ;;  %s982_s18 = sphi %s1056_s18, %s1369_s18  }
   0xc   : > { %p60_p0 = scmp.ne.s32.totalorder %s986_s19, %s982_s18  ;;  %p1351_p1 = scmp.eq.s32.totalorder %s1087_s24, 0 }
   0xd   : > { %p134_p3 = scmp.eq.s32.totalorder %s1349_s25, 1  ;;  %p656_p5 = scmp.ge.s32.totalorder %s1002_s23, 1 }
   0xe   : > { %p1098_p4 = por %p1351_p1, %p60_p0  ;;  %p197_p7 = scmp.lt.s32.totalorder %s1002_s23, 3 }
   0xf   : > { %p1103_p6 = por %p134_p3, %p60_p0  ;;  %s1004_s29 = smov [#allocation5]  }
  0x10   : > { %p1108_p8 = pnand %p656_p5, %p197_p7  ;;  %s209_s30 = sshll.u32 %s1004_s29, 4  ;;  %s210_s30 = int_to_ptr.vmem [resolvable:$true] %s209_s30 }
  0x11   : > { %s1354_s27 = scalar_select %p1103_p6, 1, 0 }
  0x12   : > { %p720_p9 = pneg %p1108_p8  ;;  %s38_s7 = sadd.s32 1, %s998_s22 }
  0x13   : > { %s819_s8 = scalar_lea.vmem %s210_s30, 512  ;;  %p827_p5 = scmp.lt.s32.totalorder %s210_s30, %s210_s30 }
  0x14   : > { %p1117_p11 = pnand %p720_p9, %p1351_p1  ;;  %p820_p13 = scmp.ne.s32.totalorder %s210_s30, %s819_s8 }
  0x15   : > { %p828_p7 = scmp.lt.s32.totalorder %s819_s8, %s819_s8 }
  0x16   : > { %p810_p12 = pneg %p1117_p11 }
  0x17   : > { %p829_p2 = por %p828_p7, %p827_p5 }
  0x18   : > { %p822_p0 = pnand %p820_p13, %p810_p12 }
  0x1a   : > { %p823_p3 = pneg %p822_p0 }
  0x1c   : > { %p830_p6 = pnand %p829_p2, %p823_p3 }
  0x1e   : > { %833 = shalt.err (!%p830_p6)
}
  0x1f   : > { %s1005_s9 = smov 128   ;;  %s1006_s10 = smov 8  }
  0x20   : > { %s1357_s1 = sld [smem:[#allocation16_spill]]  ;;  %p40_p2 = scmp.ge.s32.totalorder %s38_s7, 2 }
  0x21   : > { %s47_s13 = sadd.s32 1, %s990_s20  ;;  %p54_p6 = scmp.ne.s32.totalorder %s990_s20, %s986_s19 }
  0x22   : > { %p55_p9 = scmp.eq.s32.totalorder %s1002_s23, 0  ;;  %s1375_s7 = smov (%p40_p2, %s38_s7), 0 }
  0x23   : > { %1358 = sst [smem:[#allocation15_spill]] %s1375_s7  ;;  %p1360_p13 = scmp.eq.s32.totalorder %s1087_s24, 1 }
  0x24   : > { %p1135_p12 = por %p55_p9, %p54_p6  ;;  %s42_s16 = ssub.s32 %s998_s22, %s1375_s7 }
  0x25   : > { %p1141_p0 = por %p1360_p13, %p54_p6  ;;  %p739_p3 = scmp.lt.s32.totalorder %s1002_s23, 2 }
  0x26   : > { %723 = dma.hbm_to_vmem [thread:$0]  (!%p1117_p11), %s1357_s1, 512, %s210_s30, [#allocation6], %s1005_s9, %s1005_s9, %s1006_s10  }
  0x27   : > { %p45_p11 = scmp.eq.s32.totalorder %s42_s16, 0  ;;  %s226_s17 = sand.u32 1, %s990_s20  }
  0x28   : > { %s659_s29 = sshll.u32 %s226_s17, 3  ;;  %s660_s6 = sshll.u32 %s998_s22, 7 }
  0x29   : > { %s1150_s30 = scalar_select %p45_p11, %s990_s20, %s47_s13  }
  0x2a   : > { %s236_s10 = scalar_lea.hbm %s1343_s0, %s660_s6  ;;  %s230_s11 = scalar_lea.vmem [#allocation2], %s659_s29 }
  0x2b   : > { %s238_s12 = sshll.u32 %s230_s11, 4  ;;  %p1158_p5 = pnand %p739_p3, %p1135_p12  ;;  %s239_s12 = int_to_ptr.vmem [resolvable:$true] %s238_s12 }
  0x2c   : > { %s227_s1 = scalar_lea.sflag [#allocation3], %s226_s17  ;;  %s847_s16 = scalar_lea.vmem %s239_s12, 128 }
  0x2d   : > { %p836_p7 = pneg %p1158_p5  ;;  %p848_p2 = scmp.ne.s32.totalorder %s239_s12, %s847_s16 }
  0x2e   : > { %s1007_s13 = smov [#allocation2]  }
  0x2f   : > { %p850_p6 = pnand %p848_p2, %p836_p7  ;;  %s852_s7 = sshll.u32 %s1007_s13, 4  ;;  %s853_s7 = int_to_ptr.vmem [resolvable:$false] %s852_s7 }
  0x30   : > { %s854_s6 = scalar_lea.vmem %s853_s7, 256  ;;  %p855_p13 = scmp.lt.s32.totalorder %s239_s12, %s853_s7 }
  0x31   : > { %p851_p9 = pneg %p850_p6  ;;  %p856_p11 = scmp.lt.s32.totalorder %s854_s6, %s847_s16 }
  0x33   : > { %p857_p10 = por %p856_p11, %p855_p13 }
  0x35   : > { %p858_p1 = pnand %p857_p10, %p851_p9 }
  0x37   : > { %861 = shalt.err (!%p858_p1)
}
  0x38   : > { %727 = dma.hbm_to_vmem [thread:$0]  (!%p1158_p5), %s236_s10, 128, %s239_s12, %s227_s1  }
  0x39   : > { %247 = sbr.rel (%p1108_p8) target bundleno = 448 (0x1c0), region = 32  ;;  %s1169_s14 = sand.u32 (!%p1108_p8), 1, %s986_s19  }
  0x3a   : > { %s662_s17 = sshll.u32 (!%p1108_p8), %s1169_s14, 3  ;;  %s250_s29 = scalar_lea.sflag (!%p1108_p8), [#allocation3], %s1169_s14 }
  0x3b   : > { %s253_s8 = scalar_lea.vmem (!%p1108_p8), [#allocation2], %s662_s17 }
  0x3e   : > { %965 = dma.done.wait (%p1098_p4), %s250_s29, 128  }
  0x3f   : > { %967 = vsyncadd (%p1098_p4), %s250_s29, 4294967168  ;;  %p1363_p1 = scmp.eq.s32.totalorder %s1087_s24, 0 }
  0x41   : > { %969 = dma.done.wait (%p1363_p1), [#allocation6], 512   ;;  %p1364_p10 = pmov %p1363_p1 }
  0x42   : > { %v1008_v0 = vmov 0.0   ;;  %vm1009_vm0 = vmmov 0   ;;  %v298_v1 = vld [vmem:[#allocation5 + $0x18] sm:$0xff]  ;;  %v297_v2 = vld [vmem:[#allocation5 + $0x10] sm:$0xff]  ;;  %v296_v3 = vld [vmem:[#allocation5 + $0x8] sm:$0xff]  ;;  %vm306_vm1 = vcmask 261120  }
  0x43   : > { %971 = vsyncadd (%p1364_p10), [#allocation6], 4294966784  ;;  %697 = vmatprep.subr.mxu0 %v1008_v0  ;;  %705 = vmatprep.mubr.msk.f32.mxu0 %vm1009_vm0, %v1008_v0  ;;  %v295_v4 = vld [vmem:[#allocation5] sm:$0xff]  ;;  %v294_v5 = vld [vmem:[%s253_s8] sm:$0xff]  ;;  %s1182_s1 = sshll.u32 %s1169_s14, 5  ;;  %vm380_vm2 = vcmask 64512  }
  0x44   : > { %698 = vmatpush3.msra.mxu0 %v298_v1  ;;  %v667_v6 = vld [vmem:[%s1345_s2] ss:$0 sm:$0xff]  ;;  %s1010_s28 = smov 80   ;;  %s1011_s7 = smov 96  }
  0x45   : > { %699 = vmatprep.subr.mxu0 %v1008_v0  ;;  %s1188_s9 = scalar_lea.vmem [#allocation7], %s1182_s1  ;;  %s1012_s10 = smov 72  }
  0x46   : > { %700 = vmatpush3.msra.mxu0 %v297_v2  ;;  %s1013_s11 = smov 88   ;;  %s1014_s12 = smov 112  }
  0x47   : > { %701 = vmatprep.subr.mxu0 %v1008_v0  ;;  %s1015_s16 = smov 120   ;;  %s1016_s13 = smov 64  }
  0x48   : > { %702 = vmatpush3.msra.mxu0 %v296_v3  ;;  %s1017_s6 = smov 104   ;;  %s1018_s17 = smov 48  }
  0x49   : > { %703 = vmatprep.subr.mxu0 %v1008_v0  ;;  %s1019_s29 = smov 56   ;;  %s1020_s8 = smov 40  }
  0x4a   : > { %704 = vmatpush3.msra.mxu0 %v295_v4  ;;  %s286_s25 = scalar_lea.vmem [#allocation8], %s1182_s1 }
  0x4b   : > { %706 = vmatmul.mubr.msk.f32.vlgmr.msra.gmra.mxu0 %vm306_vm1, %v294_v5  ;;  %s478_s26 = sshll.u32 %s286_s25, 4  ;;  %s1197_s26 = int_to_ptr.vmem [resolvable:$true] %s478_s26 }
 0x10b   : > { %v376_v7 = vpop.f32.mrf.mxu0 }
 0x10c   : > { %v377_v8 = vadd.f32 %v667_v6, %v376_v7 }
 0x10d   : > { %v707_v9 = vpop.f32.mrf.mxu0 }
 0x10e   : > { %407 = vrot.lane.b32.xlu1 %v377_v8, %s1010_s28  ;;  %398 = vrot.lane.b32.xlu0 %v377_v8, %s1011_s7  ;;  %381 = vst.msk [vmem:[%s1188_s9] sm:$0xff] %vm380_vm2, %v377_v8  ;;  %s441_s28 = sand.u32 1, %s1087_s24   ;;  %s1195_s7 = sshll.u32 %s994_s21, 9 }
 0x10f   : > { %s1209_s21 = scalar_lea.sflag [#allocation9], %s441_s28  ;;  %s862_s24 = scalar_lea.vmem %s1197_s26, 512 }
 0x110   : > { %p863_p4 = scmp.ne.s32.totalorder %s1197_s26, %s862_s24 }
 0x112   : > { %412 = vrot.lane.b32.xlu1 %v377_v8, %s1012_s10  ;;  %402 = vrot.lane.b32.xlu0 %v377_v8, %s1013_s11  ;;  %p864_p8 = pnand %p863_p4, %p1141_p0 }
 0x114   : > { %p865_p12 = pneg %p864_p8 }
 0x116   : > { %388 = vrot.lane.b32.xlu1 %v377_v8, %s1014_s12  ;;  %383 = vrot.lane.b32.xlu0 %v377_v8, %s1015_s16  ;;  %s1205_s12 = scalar_lea.hbm %s1347_s4, %s1195_s7  ;;  %s1021_s16 = smov [#allocation8]  }
 0x11a   : > { %417 = vrot.lane.b32.xlu1 %v377_v8, %s1016_s13  ;;  %393 = vrot.lane.b32.xlu0 %v377_v8, %s1017_s6  ;;  %s866_s13 = sshll.u32 %s1021_s16, 4  ;;  %s867_s13 = int_to_ptr.vmem [resolvable:$false] %s866_s13 }
 0x11b   : > { %s868_s6 = scalar_lea.vmem %s867_s13, 1024  ;;  %p869_p3 = scmp.lt.s32.totalorder %s1197_s26, %s867_s13 }
 0x11c   : > { %p870_p5 = scmp.lt.s32.totalorder %s868_s6, %s862_s24 }
 0x11e   : > { %426 = vrot.lane.b32.xlu1 %v377_v8, %s1018_s17  ;;  %421 = vrot.lane.b32.xlu0 %v377_v8, %s1019_s29  ;;  %p871_p7 = por %p870_p5, %p869_p3 }
 0x120   : > { %p872_p2 = pnand %p871_p7, %p865_p12 }
 0x122   : > { %431 = vrot.lane.b32.xlu0 %v377_v8, %s1020_s8 }
 0x180   : > { %v408_v10 = vpop.permute.xlu1 %407  ;;  %v399_v11 = vpop.permute.xlu0 %398 }
 0x181   : > { %673 = vst.msk [vmem:[%s286_s25 + $0x10] sm:$0xff] %vm380_vm2, %v408_v10  ;;  %401 = vst.msk [vmem:[%s286_s25] sm:$0xff] %vm380_vm2, %v399_v11 }
 0x184   : > { %v413_v12 = vpop.permute.xlu1 %412  ;;  %v403_v13 = vpop.permute.xlu0 %402 }
 0x185   : > { %674 = vst.msk [vmem:[%s286_s25 + $0x18] sm:$0xff] %vm380_vm2, %v413_v12  ;;  %672 = vst.msk [vmem:[%s286_s25 + $0x8] sm:$0xff] %vm380_vm2, %v403_v13 }
 0x186   : > { %875 = shalt.err (!%p872_p2)
}
 0x187   : > { %s876_s17 = scalar_lea.hbm %s1205_s12, 512  ;;  %s880_s25 = scalar_lea.hbm %s1347_s4, 1024 }
 0x188   : > { %p877_p6 = scmp.ne.s32.totalorder %s1205_s12, %s876_s17  ;;  %p881_p11 = scmp.lt.s32.totalorder %s1205_s12, %s1347_s4 }
 0x189   : > { %p882_p1 = scmp.lt.s32.totalorder %s880_s25, %s876_s17 }
 0x18a   : > { %p878_p9 = pnand %p877_p6, %p1141_p0 }
 0x18b   : > { %p883_p10 = por %p882_p1, %p881_p11 }
 0x18c   : > { %p879_p13 = pneg %p878_p9 }
 0x18e   : > { %p884_p4 = pnand %p883_p10, %p879_p13 }
 0x190   : > { %887 = shalt.err (!%p884_p4)
}
 0x191   : > { %s1022_s11 = smov 128   ;;  %s1023_s24 = smov 8   ;;  %v389_v14 = vpop.permute.xlu1 %388  ;;  %v384_v15 = vpop.permute.xlu0 %383 }
 0x192   : > { %715 = dma.vmem_to_hbm [thread:$0]  (%p1141_p0), %s1197_s26, 512, %s1205_s12, %s1209_s21, %s1022_s11, %s1022_s11, %s1023_s24  }
 0x193   : > { %s461_s16 = sshll.u32 %s1188_s9, 4  ;;  %670 = vst.msk [vmem:[%s1188_s9 + $0x10] sm:$0xff] %vm380_vm2, %v389_v14  ;;  %669 = vst.msk [vmem:[%s1188_s9 + $0x8] sm:$0xff] %vm380_vm2, %v384_v15  ;;  %s1246_s17 = scalar_lea.hbm %s1346_s3, %s1195_s7  ;;  %s1240_s16 = int_to_ptr.vmem [resolvable:$true] %s461_s16 }
 0x194   : > { %s1249_s26 = scalar_lea.vmem [#allocation10], %s1182_s1  ;;  %s437_s12 = scalar_lea.sflag [#allocation4], %s1169_s14 }
 0x195   : > { %v418_v16 = vpop.permute.xlu1 %417  ;;  %v394_v17 = vpop.permute.xlu0 %393  ;;  %s888_s29 = scalar_lea.vmem %s1240_s16, 512  ;;  %s1024_s8 = smov [#allocation7]  }
 0x196   : > { %420 = vst.msk [vmem:[%s1249_s26] sm:$0xff] %vm380_vm2, %v418_v16  ;;  %671 = vst.msk [vmem:[%s1188_s9 + $0x18] sm:$0xff] %vm380_vm2, %v394_v17  ;;  %p889_p8 = scmp.ne.s32.totalorder %s1240_s16, %s888_s29  ;;  %s892_s25 = sshll.u32 %s1024_s8, 4  ;;  %s893_s25 = int_to_ptr.vmem [resolvable:$false] %s892_s25 }
 0x197   : > { %s894_s28 = scalar_lea.vmem %s893_s25, 1024  ;;  %p895_p5 = scmp.lt.s32.totalorder %s1240_s16, %s893_s25 }
 0x198   : > { %p890_p12 = pnand %p889_p8, %p1141_p0  ;;  %p896_p7 = scmp.lt.s32.totalorder %s894_s28, %s888_s29 }
 0x19a   : > { %p891_p3 = pneg %p890_p12  ;;  %p897_p2 = por %p896_p7, %p895_p5 }
 0x19c   : > { %p898_p6 = pnand %p897_p2, %p891_p3 }
 0x19e   : > { %901 = shalt.err (!%p898_p6)
}
 0x19f   : > { %s902_s1 = scalar_lea.hbm %s1246_s17, 512  ;;  %s906_s10 = scalar_lea.hbm %s1346_s3, 1024 }
 0x1a0   : > { %p903_p9 = scmp.ne.s32.totalorder %s1246_s17, %s902_s1  ;;  %p907_p1 = scmp.lt.s32.totalorder %s1246_s17, %s1346_s3 }
 0x1a1   : > { %p908_p10 = scmp.lt.s32.totalorder %s906_s10, %s902_s1 }
 0x1a2   : > { %p904_p13 = pnand %p903_p9, %p1141_p0 }
 0x1a3   : > { %p909_p4 = por %p908_p10, %p907_p1 }
 0x1a4   : > { %p905_p11 = pneg %p904_p13 }
 0x1a6   : > { %p910_p8 = pnand %p909_p4, %p905_p11 }
 0x1a8   : > { %913 = shalt.err (!%p910_p8)
}
 0x1a9   : > { %714 = dma.vmem_to_hbm [thread:$0]  (%p1141_p0), %s1240_s16, 512, %s1246_s17, %s437_s12, %s1022_s11, %s1022_s11, %s1023_s24   ;;  %v427_v18 = vpop.permute.xlu1 %426  ;;  %v422_v19 = vpop.permute.xlu0 %421 }
 0x1aa   : > { %s495_s29 = sshll.u32 %s1249_s26, 4  ;;  %676 = vst.msk [vmem:[%s1249_s26 + $0x10] sm:$0xff] %vm380_vm2, %v427_v18  ;;  %675 = vst.msk [vmem:[%s1249_s26 + $0x8] sm:$0xff] %vm380_vm2, %v422_v19  ;;  %s1290_s28 = scalar_lea.hbm %s1348_s5, %s1195_s7  ;;  %s1284_s29 = int_to_ptr.vmem [resolvable:$true] %s495_s29 }
 0x1ab   : > { %s914_s16 = scalar_lea.vmem %s1284_s29, 512  ;;  %s1025_s17 = smov [#allocation10]  }
 0x1ac   : > { %p915_p12 = scmp.ne.s32.totalorder %s1284_s29, %s914_s16  ;;  %s918_s12 = sshll.u32 %s1025_s17, 4  ;;  %s919_s12 = int_to_ptr.vmem [resolvable:$false] %s918_s12 }
 0x1ad   : > { %v432_v20 = vpop.permute.xlu0 %431  ;;  %s920_s1 = scalar_lea.vmem %s919_s12, 1024  ;;  %p921_p7 = scmp.lt.s32.totalorder %s1284_s29, %s919_s12 }
 0x1ae   : > { %677 = vst.msk [vmem:[%s1249_s26 + $0x18] sm:$0xff] %vm380_vm2, %v432_v20  ;;  %p916_p3 = pnand %p915_p12, %p1141_p0  ;;  %p922_p2 = scmp.lt.s32.totalorder %s920_s1, %s914_s16 }
 0x1b0   : > { %p917_p5 = pneg %p916_p3  ;;  %p923_p6 = por %p922_p2, %p921_p7 }
 0x1b2   : > { %p924_p9 = pnand %p923_p6, %p917_p5 }
 0x1b4   : > { %927 = shalt.err (!%p924_p9)
}
 0x1b5   : > { %s928_s7 = scalar_lea.hbm %s1290_s28, 512  ;;  %s932_s9 = scalar_lea.hbm %s1348_s5, 1024 }
 0x1b6   : > { %p929_p13 = scmp.ne.s32.totalorder %s1290_s28, %s928_s7  ;;  %p933_p10 = scmp.lt.s32.totalorder %s1290_s28, %s1348_s5 }
 0x1b7   : > { %p934_p4 = scmp.lt.s32.totalorder %s932_s9, %s928_s7 }
 0x1b8   : > { %p930_p11 = pnand %p929_p13, %p1141_p0 }
 0x1b9   : > { %p935_p8 = por %p934_p4, %p933_p10 }
 0x1ba   : > { %p931_p1 = pneg %p930_p11 }
 0x1bc   : > { %p936_p12 = pnand %p935_p8, %p931_p1 }
 0x1be   : > { %939 = shalt.err (!%p936_p12)
}
 0x1bf   : > { %716 = dma.vmem_to_hbm [thread:$0]  (%p1141_p0), %s1284_s29, 512, %s1290_s28, %s1209_s21, %s1022_s11, %s1022_s11, %s1023_s24  }
 0x1c0 PF: > { %s510_s6 = sand.u32 1, %s982_s18   ;;  %p1365_p3 = scmp.ne.s32.totalorder %s1354_s27, 0 }
 0x1c1   : > { %p1366_p5 = scmp.ge.s32.totalorder %s1002_s23, 2  ;;  %s511_s8 = scalar_lea.sflag [#allocation4], %s510_s6 }
 0x1c3   : > { %p729_p7 = pnand %p1366_p5, %p1365_p3 }
 0x1c5   : > { %p730_p2 = pneg %p729_p7 }
 0x1c7   : > { %973 = dma.done.wait (%p730_p2), %s511_s8, 512  }
 0x1c8   : > { %975 = vsyncadd (%p730_p2), %s511_s8, 4294966784  ;;  %s1367_s15 = sadd.s32 4294967294, %s1002_s23  }
 0x1c9   : > { %s519_s25 = sand.u32 1, %s1367_s15  }
 0x1ca   : > { %s520_s16 = scalar_lea.sflag [#allocation9], %s519_s25 }
 0x1cb   : > { %977 = dma.done.wait (%p730_p2), %s520_s16, 1024  }
 0x1cc   : > { %979 = vsyncadd (%p730_p2), %s520_s16, 4294966272  ;;  %s26_s23 = sadd.s32 1, %s1002_s23   ;;  %s1368_s27 = sld [smem:[#allocation15_spill]] }
 0x1cd   : > { %p23_p0 = scmp.ge.s32.totalorder %s26_s23, 4   ;;  %s1369_s18 = smov %s986_s19 }
 0x1ce   : > { %s1370_s19 = smov %s990_s20  ;;  %s1371_s20 = smov %s1150_s30 }
 0x1cf   : > { %s1372_s21 = smov %s998_s22  ;;  %25 = sbr.rel (!%p23_p0) target bundleno = 11 (0xb), region = 122 }
 0x1d2   : > { %s1373_s22 = smov %s1368_s27 }
 0x1d4   :  { %534 = vsyncpa [#allocation3], 1 }
 0x1d5   :  { %536 = vsyncpa [#allocation3 + $0x1], 1 }
 0x1d6   :  { %537 = vsyncpa [#allocation6], 1 }
 0x1d7   :  { %538 = vsyncpa [#allocation4], 1 }
 0x1d8   :  { %540 = vsyncpa [#allocation4 + $0x1], 1 }
 0x1d9   :  { %541 = vsyncpa [#allocation9], 1 }
 0x1da   :  { %543 = vsyncpa [#allocation9 + $0x1], 1 }

</bundles_post_ra>
